<compile_context>
chip_gen: v7x
topology: tpu7x:2x2x1
jax: 0.10.0
libtpu: 0.0.40
codegen_flags: <defaults>
</compile_context>

<pallas_src>
import functools

import jax
import jax.numpy as jnp
from jax import lax
from jax.experimental import pallas as pl
from jax.experimental.pallas import tpu as pltpu

_LANES = 128
_SUBLANES = 8


def _velo_loss_kernel(pred_ref, gt_ref, out_ref, *, rows_valid, block_rows,
                      chunk_rows, num_chunks, need_mask, unroll):
    """Accumulates S1 = sum(gt * tanh(6*pred - 3)) and S2 = sum(gt).

    out_ref is a resident (2, 8, 128) f32 accumulator: out_ref[0] holds S1
    partials, out_ref[1] holds S2 partials.  Cross-lane reduce happens in the
    wrapper.
    """
    step = pl.program_id(0)

    @pl.when(step == 0)
    def _():
        out_ref[...] = jnp.zeros(out_ref.shape, out_ref.dtype)

    base = step * block_rows
    if need_mask:
        # Hoisted once per grid step; inside the loop only a scalar threshold
        # changes (compare against rows_valid - (base + r0)).
        row_iota = lax.broadcasted_iota(jnp.int32, (chunk_rows, _LANES), 0)

    def body(c, carry):
        s1, s2 = carry
        r0 = pl.multiple_of(c * chunk_rows, chunk_rows)
        p = pred_ref[pl.ds(r0, chunk_rows), :].astype(jnp.float32)
        g = gt_ref[pl.ds(r0, chunk_rows), :].astype(jnp.float32)
        # sigmoid(12*(x-0.5)) == 0.5*(tanh(6x - 3) + 1): single EUP
        # transcendental; the 0.5*(.+1) is folded into the wrapper combine.
        t = jnp.tanh(p * 6.0 - 3.0)
        prod = g * t
        if need_mask:
            # Mask products (not just gt): OOB padding is undefined and could
            # contain NaN bit patterns; jnp.where is a select, so NaNs in the
            # discarded branch are harmless.
            valid = row_iota < (rows_valid - (base + r0))
            prod = jnp.where(valid, prod, 0.0)
            g = jnp.where(valid, g, 0.0)
        # Leading-axis fold into (8,128) vreg accumulators: pure VPU adds,
        # no XLU cross-lane reduce, no SMEM scalar RMW.
        s1 = s1 + prod.reshape(-1, _SUBLANES, _LANES).sum(axis=0)
        s2 = s2 + g.reshape(-1, _SUBLANES, _LANES).sum(axis=0)
        return s1, s2

    zero = jnp.zeros((_SUBLANES, _LANES), jnp.float32)
    s1, s2 = lax.fori_loop(0, num_chunks, body, (zero, zero), unroll=unroll)

    out_ref[0] += s1
    out_ref[1] += s2


@functools.partial(jax.jit, static_argnames=("max_block_rows",))
def velo_label_consistency_loss(pred: jax.Array, gt: jax.Array, *,
                                max_block_rows: int = 8192) -> jax.Array:
    """pred: [..., 1], gt: [...] (same leading shape) -> scalar f32 loss.

    loss = mean(gt * sigmoid((pred.squeeze(-1) - 0.5) * 12))

    Pass bf16 pred/gt to halve HBM traffic; accumulation is always f32.
    """
    assert pred.shape[-1] == 1, "pred is expected to carry a trailing singleton"
    pred_flat = pred.reshape(-1)
    gt_flat = gt.reshape(-1)
    n = pred_flat.shape[0]
    assert gt_flat.shape[0] == n, "pred.squeeze(-1) and gt sizes must match"

    # (8,128)-aligned prefix handled by the kernel; the < 1024-element tail is
    # summed with plain jnp (negligible traffic, no concatenate/pad copies).
    rows_main = (n // (_SUBLANES * _LANES)) * _SUBLANES
    n_main = rows_main * _LANES

    if n_main < n:
        p_t = pred_flat[n_main:].astype(jnp.float32)
        g_t = gt_flat[n_main:].astype(jnp.float32)
        tail_sum = jnp.sum(g_t * (0.5 * (jnp.tanh(p_t * 6.0 - 3.0) + 1.0)))
    else:
        tail_sum = jnp.float32(0.0)

    if rows_main == 0:
        # Input too small for a single (8,128) tile: pure-jnp path.
        return (tail_sum / jnp.float32(n)).astype(jnp.float32)

    pred_main = pred_flat if n_main == n else pred_flat[:n_main]
    gt_main = gt_flat if n_main == n else gt_flat[:n_main]
    pred2d = pred_main.reshape(rows_main, _LANES)
    gt2d = gt_main.reshape(rows_main, _LANES)

    # Block / chunk sizing (all static).
    block_rows = min(max_block_rows, rows_main)
    chunk_rows = min(512, block_rows)
    block_rows = (block_rows // chunk_rows) * chunk_rows   # multiple of chunk
    num_chunks = block_rows // chunk_rows
    steps = -(-rows_main // block_rows)
    need_mask = (rows_main % block_rows) != 0
    unroll = max(1, min(8, num_chunks))

    in_itemsize = pred2d.dtype.itemsize + gt2d.dtype.itemsize
    # Double-buffered input blocks + headroom for chunk-sized intermediates.
    in_buf_bytes = 2 * block_rows * _LANES * in_itemsize
    vmem_limit = int(min(100 * 1024 * 1024,
                         max(32 * 1024 * 1024, in_buf_bytes + 16 * 1024 * 1024)))

    kernel = functools.partial(
        _velo_loss_kernel,
        rows_valid=rows_main, block_rows=block_rows, chunk_rows=chunk_rows,
        num_chunks=num_chunks, need_mask=need_mask, unroll=unroll)

    cost = pl.CostEstimate(
        flops=6 * n_main,
        transcendentals=n_main,
        bytes_accessed=n_main * in_itemsize + 2 * _SUBLANES * _LANES * 4,
    )

    partials = pl.pallas_call(
        kernel,
        out_shape=jax.ShapeDtypeStruct((2, _SUBLANES, _LANES), jnp.float32),
        grid_spec=pltpu.PrefetchScalarGridSpec(
            num_scalar_prefetch=0,
            grid=(steps,),
            in_specs=[
                pl.BlockSpec((block_rows, _LANES), lambda i: (i, 0)),
                pl.BlockSpec((block_rows, _LANES), lambda i: (i, 0)),
            ],
            out_specs=pl.BlockSpec((2, _SUBLANES, _LANES), lambda i: (0, 0, 0)),
        ),
        compiler_params=pltpu.CompilerParams(
            dimension_semantics=("arbitrary",),
            vmem_limit_bytes=vmem_limit,
        ),
        cost_estimate=cost,
    )(pred2d, gt2d)

    # gt*contact = 0.5*(gt*tanh + gt)  =>  sum = 0.5*(S1 + S2).
    main_sum = 0.5 * (jnp.sum(partials[0]) + jnp.sum(partials[1]))
    return ((main_sum + tail_sum) / jnp.float32(n)).astype(jnp.float32)


def _reference(pred, gt):
    contact = jax.nn.sigmoid((jnp.squeeze(pred, -1).astype(jnp.float32) - 0.5)
                             * 2.0 * 6.0)
    return jnp.mean(gt.astype(jnp.float32) * contact)


if __name__ == "__main__":
    key = jax.random.PRNGKey(0)
    k_pred, k_gt, k_pred2, k_gt2 = jax.random.split(key, 4)

    # Shapes consistent with the forward: pred [B, H, W, 1], gt [B, H, W].
    B, H, W = 2, 64, 128
    pred = jax.random.uniform(k_pred, (B, H, W, 1), dtype=jnp.float32)
    gt = jax.random.uniform(k_gt, (B, H, W), dtype=jnp.float32)

    loss = jax.block_until_ready(velo_label_consistency_loss(pred, gt))
    ref = _reference(pred, gt)
    assert jnp.allclose(loss, ref, rtol=1e-5, atol=1e-6), (loss, ref)

    # Ragged shape exercises the aligned-prefix + jnp-tail path.
    B2, H2, W2 = 2, 17, 33
    pred2 = jax.random.uniform(k_pred2, (B2, H2, W2, 1), dtype=jnp.float32)
    gt2 = jax.random.uniform(k_gt2, (B2, H2, W2), dtype=jnp.float32)
    loss2 = jax.block_until_ready(velo_label_consistency_loss(pred2, gt2))
    ref2 = _reference(pred2, gt2)
    assert jnp.allclose(loss2, ref2, rtol=1e-5, atol=1e-6), (loss2, ref2)

    # bf16 inputs (halved HBM traffic path); f32 accumulation in-kernel.
    pred_bf = pred.astype(jnp.bfloat16)
    gt_bf = gt.astype(jnp.bfloat16)
    loss3 = jax.block_until_ready(velo_label_consistency_loss(pred_bf, gt_bf))
    ref3 = _reference(pred_bf, gt_bf)
    assert jnp.allclose(loss3, ref3, rtol=1e-4, atol=1e-5), (loss3, ref3)

    print("KERNEL_OK")
</pallas_src>

<mosaic_0001>
module attributes {stable_mosaic.version = 11 : i64} {
  func.func @_velo_loss_kernel(%arg0: i32, %arg1: memref<128x128xf32, #tpu.memory_space<vmem>>, %arg2: memref<128x128xf32, #tpu.memory_space<vmem>>, %arg3: memref<2x8x128xf32, #tpu.memory_space<vmem>>) attributes {dimension_semantics = [#tpu.dimension_semantics<arbitrary>], iteration_bounds = array<i64: 1>, scalar_prefetch = 0 : i64, scratch_operands = 0 : i64, tpu.core_type = #tpu.core_type<tc>, window_params = [{transform_indices = @transform_0, window_bounds = array<i64: 128, 128>}, {transform_indices = @transform_1, window_bounds = array<i64: 128, 128>}, {pipeline_mode = #tpu.pipeline_mode<synchronous>, transform_indices = @transform_2, window_bounds = array<i64: 2, 8, 128>}]} {
    %c0_i32 = arith.constant 0 : i32
    %0 = arith.cmpi eq, %arg0, %c0_i32 : i32
    %1 = arith.extui %0 : i1 to i32
    %c0_i32_0 = arith.constant 0 : i32
    %2 = arith.cmpi ne, %1, %c0_i32_0 : i32
    scf.if %2 {
      %cst_18 = arith.constant 0.000000e+00 : f32
      %34 = vector.broadcast %cst_18 : f32 to vector<2x8x128xf32>
      %c0_19 = arith.constant 0 : index
      %c0_20 = arith.constant 0 : index
      %c0_21 = arith.constant 0 : index
      %35 = vector.load %arg3[%c0_19, %c0_20, %c0_21] : memref<2x8x128xf32, #tpu.memory_space<vmem>>, vector<2x8x128xf32>
      tpu.vector_store %arg3[%c0_19, %c0_20, %c0_21], %34 {strides = array<i32>} : memref<2x8x128xf32, #tpu.memory_space<vmem>>, vector<2x8x128xf32>,
    } else {
    }
    %cst = arith.constant 0.000000e+00 : f32
    %3 = vector.broadcast %cst : f32 to vector<8x128xf32>
    %c0_i32_1 = arith.constant 0 : i32
    %c128_i32 = arith.constant 128 : i32
    %4 = arith.muli %c0_i32_1, %c128_i32 : i32
    %5 = tpu.assume_multiple %4, 128 : i32
    %6 = arith.index_cast %5 : i32 to index
    %c0 = arith.constant 0 : index
    %7 = vector.load %arg1[%6, %c0] : memref<128x128xf32, #tpu.memory_space<vmem>>, vector<128x128xf32>
    %8 = arith.index_cast %5 : i32 to index
    %c0_2 = arith.constant 0 : index
    %9 = vector.load %arg2[%8, %c0_2] : memref<128x128xf32, #tpu.memory_space<vmem>>, vector<128x128xf32>
    %cst_3 = arith.constant 6.000000e+00 : f32
    %10 = vector.broadcast %cst_3 : f32 to vector<128x128xf32>
    %11 = arith.mulf %7, %10 : vector<128x128xf32>
    %cst_4 = arith.constant 3.000000e+00 : f32
    %12 = vector.broadcast %cst_4 : f32 to vector<128x128xf32>
    %13 = arith.subf %11, %12 : vector<128x128xf32>
    %14 = math.tanh %13 : vector<128x128xf32>
    %15 = arith.mulf %9, %14 : vector<128x128xf32>
    %16 = vector.shape_cast %15 : vector<128x128xf32> to vector<16x8x128xf32>
    %cst_5 = arith.constant dense<0.000000e+00> : vector<8x128xf32>
    %17 = vector.multi_reduction <add>, %16, %cst_5 [0] : vector<16x8x128xf32> to vector<8x128xf32>
    %18 = arith.addf %3, %17 : vector<8x128xf32>
    %19 = vector.shape_cast %9 : vector<128x128xf32> to vector<16x8x128xf32>
    %cst_6 = arith.constant dense<0.000000e+00> : vector<8x128xf32>
    %20 = vector.multi_reduction <add>, %19, %cst_6 [0] : vector<16x8x128xf32> to vector<8x128xf32>
    %21 = arith.addf %3, %20 : vector<8x128xf32>
    %c1_i32 = arith.constant 1 : i32
    %c0_7 = arith.constant 0 : index
    %c0_8 = arith.constant 0 : index
    %c0_9 = arith.constant 0 : index
    %22 = vector.load %arg3[%c0_7, %c0_8, %c0_9] : memref<2x8x128xf32, #tpu.memory_space<vmem>>, vector<1x8x128xf32>
    %23 = vector.shape_cast %22 : vector<1x8x128xf32> to vector<8x128xf32>
    %24 = arith.addf %23, %18 : vector<8x128xf32>
    %c0_10 = arith.constant 0 : index
    %c0_11 = arith.constant 0 : index
    %c0_12 = arith.constant 0 : index
    %25 = vector.load %arg3[%c0_10, %c0_11, %c0_12] : memref<2x8x128xf32, #tpu.memory_space<vmem>>, vector<1x8x128xf32>
    %26 = vector.shape_cast %25 : vector<1x8x128xf32> to vector<8x128xf32>
    %27 = vector.shape_cast %24 : vector<8x128xf32> to vector<1x8x128xf32>
    tpu.vector_store %arg3[%c0_10, %c0_11, %c0_12], %27 {strides = array<i32>} : memref<2x8x128xf32, #tpu.memory_space<vmem>>, vector<1x8x128xf32>,
    %c1 = arith.constant 1 : index
    %c0_13 = arith.constant 0 : index
    %c0_14 = arith.constant 0 : index
    %28 = vector.load %arg3[%c1, %c0_13, %c0_14] : memref<2x8x128xf32, #tpu.memory_space<vmem>>, vector<1x8x128xf32>
    %29 = vector.shape_cast %28 : vector<1x8x128xf32> to vector<8x128xf32>
    %30 = arith.addf %29, %21 : vector<8x128xf32>
    %c1_15 = arith.constant 1 : index
    %c0_16 = arith.constant 0 : index
    %c0_17 = arith.constant 0 : index
    %31 = vector.load %arg3[%c1_15, %c0_16, %c0_17] : memref<2x8x128xf32, #tpu.memory_space<vmem>>, vector<1x8x128xf32>
    %32 = vector.shape_cast %31 : vector<1x8x128xf32> to vector<8x128xf32>
    %33 = vector.shape_cast %30 : vector<8x128xf32> to vector<1x8x128xf32>
    tpu.vector_store %arg3[%c1_15, %c0_16, %c0_17], %33 {strides = array<i32>} : memref<2x8x128xf32, #tpu.memory_space<vmem>>, vector<1x8x128xf32>,
    return
  }
  func.func @transform_0(%arg0: i32) -> (i32, i32) {
    %c0_i32 = arith.constant 0 : i32
    %c0_i32_0 = arith.constant 0 : i32
    return %arg0, %c0_i32 : i32, i32
  }
  func.func @transform_1(%arg0: i32) -> (i32, i32) {
    %c0_i32 = arith.constant 0 : i32
    %c0_i32_0 = arith.constant 0 : i32
    return %arg0, %c0_i32 : i32, i32
  }
  func.func @transform_2(%arg0: i32) -> (i32, i32, i32) {
    %c0_i32 = arith.constant 0 : i32
    %c0_i32_0 = arith.constant 0 : i32
    %c0_i32_1 = arith.constant 0 : i32
    %c0_i32_2 = arith.constant 0 : i32
    return %c0_i32, %c0_i32_0, %c0_i32_1 : i32, i32, i32
  }
}

</mosaic_0001>

<bundles_post_ra>
// kernel: velo_label_consistency_loss.1
= control target key start
LH: loop header
LB: loop body
LE: loop exit
PB: predicated region body
PF: predicated region fallthrough
CT: control target
= control target key end

     0   :  { %7 = vsyncpa [#allocation3], 0  ;;  %s338_s0 = inlined_call_operand.hbm [shape: f32[128,128], index: 0, kind: input, shape index: {}]   ;;  %s339_s1 = inlined_call_operand.hbm [shape: f32[128,128], index: 1, kind: input, shape index: {}]   ;;  %s340_s2 = inlined_call_operand.vmem [shape: f32[2,8,128], index: 2, kind: output, shape index: {}]  }
   0x1   :  { %8 = vsyncpa [#allocation5], 0  ;;  %s289_s9 = smov [#allocation2]   ;;  %s241_s13 = scalar_lea.hbm %s338_s0, 2048 }
   0x2   :  { %s14_s10 = sshll.u32 %s289_s9, 4  ;;  %p242_p0 = scmp.ne.s32.totalorder %s338_s0, %s241_s13  ;;  %s15_s10 = int_to_ptr.vmem [resolvable:$true] %s14_s10 }
   0x3   :  { %p245_p1 = scmp.lt.u32.totalorder %s241_s13, %s338_s0 }
   0x5   :  { %p247_p2 = pnand %p245_p1, %p242_p0 }
   0x7   :  { %250 = shalt.err (!%p247_p2)
}
   0x8   :  { %s251_s18 = scalar_lea.vmem %s15_s10, 2048  ;;  %p256_p4 = scmp.lt.s32.totalorder %s15_s10, %s15_s10 }
   0x9   :  { %p252_p3 = scmp.ne.s32.totalorder %s15_s10, %s251_s18  ;;  %p257_p5 = scmp.lt.s32.totalorder %s251_s18, %s251_s18 }
   0xb   :  { %p258_p6 = por %p257_p5, %p256_p4 }
   0xd   :  { %p259_p7 = pnand %p258_p6, %p252_p3 }
   0xf   :  { %262 = shalt.err (!%p259_p7)
}
  0x10   :  { %s290_s19 = smov 128   ;;  %s291_s20 = smov 8  }
  0x11   :  { %20 = dma.hbm_to_vmem [thread:$0]  %s338_s0, 2048, %s15_s10, [#allocation3], %s290_s19, %s290_s19, %s291_s20  }
  0x12   :  { %s292_s23 = smov [#allocation4]   ;;  %s263_s27 = scalar_lea.hbm %s339_s1, 2048 }
  0x13   :  { %s26_s24 = sshll.u32 %s292_s23, 4  ;;  %p264_p8 = scmp.ne.s32.totalorder %s339_s1, %s263_s27  ;;  %s27_s24 = int_to_ptr.vmem [resolvable:$true] %s26_s24 }
  0x14   :  { %p267_p9 = scmp.lt.u32.totalorder %s263_s27, %s339_s1 }
  0x16   :  { %p269_p10 = pnand %p267_p9, %p264_p8 }
  0x18   :  { %272 = shalt.err (!%p269_p10)
}
  0x19   :  { %s273_s4 = scalar_lea.vmem %s27_s24, 2048  ;;  %p278_p12 = scmp.lt.s32.totalorder %s27_s24, %s27_s24 }
  0x1a   :  { %p274_p11 = scmp.ne.s32.totalorder %s27_s24, %s273_s4  ;;  %p279_p13 = scmp.lt.s32.totalorder %s273_s4, %s273_s4 }
  0x1c   :  { %p280_p0 = por %p279_p13, %p278_p12 }
  0x1e   :  { %p281_p1 = pnand %p280_p0, %p274_p11 }
  0x20   :  { %284 = shalt.err (!%p281_p1)
}
  0x21   :  { %32 = dma.hbm_to_vmem [thread:$0]  %s339_s1, 2048, %s27_s24, [#allocation5], %s290_s19, %s290_s19, %s291_s20  }
  0x22   :  { %285 = dma.done.wait [#allocation3], 2048  }
  0x23   :  { %286 = vsyncadd [#allocation3], 4294965248 }
  0x24   :  { %287 = dma.done.wait [#allocation5], 2048  }
  0x25   :  { %288 = vsyncadd [#allocation5], 4294965248  ;;  %v45_v0 = vld [vmem:[#allocation2] sm:$0xff]  ;;  %v46_v1 = vld [vmem:[#allocation2 + $0x8] sm:$0xff] }
  0x26   :  { %v47_v2 = vld [vmem:[#allocation2 + $0x10] sm:$0xff]  ;;  %v48_v3 = vld [vmem:[#allocation2 + $0x18] sm:$0xff]  ;;  %v49_v4 = vld [vmem:[#allocation2 + $0x20] sm:$0xff]  ;;  %v77_v5 = vmul.f32 6.0, %v45_v0  ;;  %v78_v6 = vmul.f32 6.0, %v46_v1 }
  0x27   :  { %v50_v7 = vld [vmem:[#allocation2 + $0x28] sm:$0xff]  ;;  %v79_v8 = vmul.f32 6.0, %v47_v2  ;;  %v51_v9 = vld [vmem:[#allocation2 + $0x30] sm:$0xff]  ;;  %v80_v10 = vmul.f32 6.0, %v48_v3  ;;  %v81_v11 = vmul.f32 6.0, %v49_v4  ;;  %v52_v12 = vld [vmem:[#allocation2 + $0x38] sm:$0xff] }
  0x28   :  { %v61_v13 = vld [vmem:[#allocation4] sm:$0xff]  ;;  %v62_v14 = vld [vmem:[#allocation4 + $0x8] sm:$0xff]  ;;  %v82_v15 = vmul.f32 6.0, %v50_v7  ;;  %v186_v16 = vadd.f32 -3.0, %v77_v5  ;;  %v187_v17 = vadd.f32 -3.0, %v78_v6  ;;  %v83_v18 = vmul.f32 6.0, %v51_v9 }
  0x29   :  { %v188_v19 = vadd.f32 -3.0, %v79_v8  ;;  %v157_v20 = vadd.f32 %v62_v14, %v61_v13  ;;  %v53_v21 = vld [vmem:[#allocation2 + $0x40] sm:$0xff]  ;;  %v189_v22 = vadd.f32 -3.0, %v80_v10  ;;  %v84_v23 = vmul.f32 6.0, %v52_v12  ;;  %v54_v25 = vld [vmem:[#allocation2 + $0x48] sm:$0xff]  ;;  %v63_v26 = vld [vmem:[#allocation4 + $0x10] sm:$0xff] }
  0x2a   :  { %209 = vtanh.f32 %v186_v16  ;;  %v190_v24 = vadd.f32 -3.0, %v81_v11  ;;  %v191_v27 = vadd.f32 -3.0, %v82_v15  ;;  %v85_v28 = vmul.f32 6.0, %v53_v21  ;;  %v55_v31 = vld [vmem:[#allocation2 + $0x50] sm:$0xff]  ;;  %v64_v32 = vld [vmem:[#allocation4 + $0x18] sm:$0xff]  ;;  %v65_v37 = vld [vmem:[#allocation4 + $0x20] sm:$0xff] }
  0x2b   :  { %211 = vtanh.f32 %v187_v17  ;;  %v192_v29 = vadd.f32 -3.0, %v83_v18  ;;  %v158_v30 = vadd.f32 %v157_v20, %v63_v26  ;;  %v86_v33 = vmul.f32 6.0, %v54_v25  ;;  %v56_v36 = vld [vmem:[#allocation2 + $0x58] sm:$0xff]  ;;  %v57_v38 = vld [vmem:[#allocation2 + $0x60] sm:$0xff]  ;;  %v66_v42 = vld [vmem:[#allocation4 + $0x28] sm:$0xff] }
  0x2c   :  { %213 = vtanh.f32 %v188_v19  ;;  %v193_v34 = vadd.f32 -3.0, %v84_v23  ;;  %v87_v39 = vmul.f32 6.0, %v55_v31  ;;  %v194_v40 = vadd.f32 -3.0, %v85_v28  ;;  %v58_v47 = vld [vmem:[#allocation2 + $0x68] sm:$0xff]  ;;  %v67_v48 = vld [vmem:[#allocation4 + $0x30] sm:$0xff]  ;;  %v68_v55 = vld [vmem:[#allocation4 + $0x38] sm:$0xff] }
  0x2d   :  { %215 = vtanh.f32 %v189_v22  ;;  %v159_v35 = vadd.f32 %v158_v30, %v64_v32  ;;  %v88_v43 = vmul.f32 6.0, %v56_v36  ;;  %v195_v44 = vadd.f32 -3.0, %v86_v33  ;;  %v59_v51 = vld [vmem:[#allocation2 + $0x70] sm:$0xff]  ;;  %v60_v62 = vld [vmem:[#allocation2 + $0x78] sm:$0xff]  ;;  %v69_v63 = vld [vmem:[#allocation4 + $0x40] sm:$0xff] }
  0x2e   :  { %217 = vtanh.f32 %v190_v24  ;;  %v89_v49 = vmul.f32 6.0, %v57_v38  ;;  %v196_v52 = vadd.f32 -3.0, %v87_v39  ;;  %v90_v58 = vmul.f32 6.0, %v58_v47  ;;  %v70_v8 = vld [vmem:[#allocation4 + $0x48] sm:$0xff]  ;;  %v71_v15 = vld [vmem:[#allocation4 + $0x50] sm:$0xff]  ;;  %v72_v21 = vld [vmem:[#allocation4 + $0x58] sm:$0xff] }
  0x2f   :  { %219 = vtanh.f32 %v191_v27  ;;  %v160_v41 = vadd.f32 %v159_v35, %v65_v37  ;;  %v197_v59 = vadd.f32 -3.0, %v88_v43  ;;  %v91_v0 = vmul.f32 6.0, %v59_v51  ;;  %v73_v27 = vld [vmem:[#allocation4 + $0x60] sm:$0xff] }
  0x30   :  { %221 = vtanh.f32 %v192_v29  ;;  %v198_v4 = vadd.f32 -3.0, %v89_v49  ;;  %v92_v12 = vmul.f32 6.0, %v60_v62 }
  0x31   :  { %223 = vtanh.f32 %v193_v34  ;;  %v161_v45 = vadd.f32 %v160_v41, %v66_v42  ;;  %v200_v19 = vadd.f32 -3.0, %v91_v0 }
  0x32   :  { %225 = vtanh.f32 %v194_v40  ;;  %v201_v25 = vadd.f32 -3.0, %v92_v12 }
  0x33   :  { %v162_v54 = vadd.f32 %v161_v45, %v67_v48  ;;  %227 = vtanh.f32 %v195_v44 }
  0x34   :  { %v210_v46 = vpop.eup %209  ;;  %229 = vtanh.f32 %v196_v52 }
  0x35   :  { %v212_v50 = vpop.eup %211  ;;  %v125_v53 = vmul.f32 %v210_v46, %v61_v13  ;;  %v163_v60 = vadd.f32 %v162_v54, %v68_v55  ;;  %v199_v13 = vadd.f32 -3.0, %v90_v58  ;;  %231 = vtanh.f32 %v197_v59 }
  0x36   :  { %v126_v56 = vmul.f32 %v212_v50, %v62_v14  ;;  %v214_v57 = vpop.eup %213  ;;  %233 = vtanh.f32 %v198_v4 }
  0x37   :  { %v216_v61 = vpop.eup %215  ;;  %v127_v1 = vmul.f32 %v214_v57, %v63_v26  ;;  %v164_v6 = vadd.f32 %v163_v60, %v69_v63  ;;  %235 = vtanh.f32 %v199_v13 }
  0x38   :  { %v141_v2 = vadd.f32 %v126_v56, %v125_v53  ;;  %v218_v3 = vpop.eup %217  ;;  %v128_v5 = vmul.f32 %v216_v61, %v64_v32  ;;  %237 = vtanh.f32 %v200_v19  ;;  %v74_v32 = vld [vmem:[#allocation4 + $0x68] sm:$0xff] }
  0x39   :  { %v220_v7 = vpop.eup %219  ;;  %v129_v9 = vmul.f32 %v218_v3, %v65_v37  ;;  %v165_v14 = vadd.f32 %v164_v6, %v70_v8  ;;  %239 = vtanh.f32 %v201_v25  ;;  %v75_v37 = vld [vmem:[#allocation4 + $0x70] sm:$0xff] }
  0x3a   :  { %v142_v10 = vadd.f32 %v141_v2, %v127_v1  ;;  %v222_v11 = vpop.eup %221  ;;  %v130_v16 = vmul.f32 %v220_v7, %v66_v42  ;;  %v76_v42 = vld [vmem:[#allocation4 + $0x78] sm:$0xff] }
  0x3b   :  { %v224_v18 = vpop.eup %223  ;;  %v166_v20 = vadd.f32 %v165_v14, %v71_v15  ;;  %v131_v22 = vmul.f32 %v222_v11, %v67_v48 }
  0x3c   :  { %v143_v17 = vadd.f32 %v142_v10, %v128_v5  ;;  %v226_v24 = vpop.eup %225  ;;  %v132_v28 = vmul.f32 %v224_v18, %v68_v55 }
  0x3d   :  { %v167_v26 = vadd.f32 %v166_v20, %v72_v21  ;;  %v228_v30 = vpop.eup %227  ;;  %v133_v33 = vmul.f32 %v226_v24, %v69_v63 }
  0x3e   :  { %v144_v23 = vadd.f32 %v143_v17, %v129_v9  ;;  %v230_v35 = vpop.eup %229  ;;  %v134_v38 = vmul.f32 %v228_v30, %v70_v8 }
  0x3f   :  { %v168_v31 = vadd.f32 %v167_v26, %v73_v27  ;;  %v232_v40 = vpop.eup %231  ;;  %v135_v43 = vmul.f32 %v230_v35, %v71_v15 }
  0x40   :  { %v145_v29 = vadd.f32 %v144_v23, %v130_v16  ;;  %v234_v45 = vpop.eup %233  ;;  %v136_v47 = vmul.f32 %v232_v40, %v72_v21 }
  0x41   :  { %v169_v36 = vadd.f32 %v168_v31, %v74_v32  ;;  %v236_v49 = vpop.eup %235  ;;  %v137_v50 = vmul.f32 %v234_v45, %v73_v27 }
  0x42   :  { %v146_v34 = vadd.f32 %v145_v29, %v131_v22  ;;  %v238_v52 = vpop.eup %237  ;;  %v138_v53 = vmul.f32 %v236_v49, %v74_v32 }
  0x43   :  { %v170_v41 = vadd.f32 %v169_v36, %v75_v37  ;;  %v240_v55 = vpop.eup %239  ;;  %v139_v56 = vmul.f32 %v238_v52, %v75_v37 }
  0x44   :  { %v147_v39 = vadd.f32 %v146_v34, %v132_v28  ;;  %v140_v58 = vmul.f32 %v240_v55, %v76_v42 }
  0x45   :  { %v171_v46 = vadd.f32 %v170_v41, %v76_v42 }
  0x46   :  { %v148_v44 = vadd.f32 %v147_v39, %v133_v33 }
  0x47   :  { %203 = vst [vmem:[%s340_s2 + $0x8] sm:$0xff] %v171_v46 }
  0x48   :  { %v149_v48 = vadd.f32 %v148_v44, %v134_v38 }
  0x4a   :  { %v150_v51 = vadd.f32 %v149_v48, %v135_v43 }
  0x4c   :  { %v151_v54 = vadd.f32 %v150_v51, %v136_v47 }
  0x4e   :  { %v152_v57 = vadd.f32 %v151_v54, %v137_v50 }
  0x50   :  { %v153_v59 = vadd.f32 %v152_v57, %v138_v53 }
  0x52   :  { %v154_v60 = vadd.f32 %v153_v59, %v139_v56 }
  0x54   :  { %v155_v61 = vadd.f32 %v154_v60, %v140_v58 }
  0x56   :  { %175 = vst [vmem:[%s340_s2] sm:$0xff] %v155_v61 }
  0x57   :  { %184 = vsyncpa [#allocation3], 1 }
  0x58   :  { %185 = vsyncpa [#allocation5], 1 }

</bundles_post_ra>
